<compile_context>
chip_gen: v5e
topology: v5e:2x2
jax: 0.10.0
libtpu: 0.0.40
codegen_flags: <defaults>
</compile_context>

<pallas_src>
import functools

import jax
import jax.numpy as jnp
from jax.experimental import pallas as pl
from jax.experimental.pallas import tpu as pltpu


# --------------------------------------------------------------- kernels ----

def _ae_kernel(x_ref, w_enc_ref, b_enc_ref, w_dec_ref, b_dec_ref,
               out_ref, acc_ref):
    """One latent slab: relu(x @ W_enc + b_fold) @ W_dec, accumulated in f32."""
    j = pl.program_id(1)

    latent = jnp.dot(x_ref[...], w_enc_ref[...],
                     preferred_element_type=jnp.float32)
    latent = jnp.maximum(latent + b_enc_ref[...], 0.0)
    partial = jnp.dot(latent.astype(w_dec_ref.dtype), w_dec_ref[...],
                      preferred_element_type=jnp.float32)

    @pl.when(j == 0)
    def _first():          # store, don't zero-init + add
        acc_ref[...] = partial

    @pl.when(j > 0)
    def _accum():
        acc_ref[...] += partial

    @pl.when(j == pl.num_programs(1) - 1)
    def _finalize():
        out_ref[...] = (acc_ref[...] + b_dec_ref[...]).astype(out_ref.dtype)


def _ae_kernel_with_latent(x_ref, w_enc_ref, b_enc_ref, w_dec_ref, b_dec_ref,
                           out_ref, latent_ref):
    """Same, but also writes the f32 latent slab; accumulates directly into
    the (f32, VMEM-resident across j) output block -- no scratch needed."""
    j = pl.program_id(1)

    latent = jnp.dot(x_ref[...], w_enc_ref[...],
                     preferred_element_type=jnp.float32)
    latent = jnp.maximum(latent + b_enc_ref[...], 0.0)
    latent_ref[...] = latent
    partial = jnp.dot(latent.astype(w_dec_ref.dtype), w_dec_ref[...],
                      preferred_element_type=jnp.float32)

    @pl.when(j == 0)
    def _first():
        out_ref[...] = partial + b_dec_ref[...]

    @pl.when(j > 0)
    def _accum():
        out_ref[...] += partial


# ---------------------------------------------------------------- tiling ----

def _round_up(x, m):
    return ((x + m - 1) // m) * m


@functools.lru_cache(maxsize=1)
def _vmem_capacity_bytes():
    try:
        return int(pltpu.get_tpu_info().vmem_capacity_bytes)
    except Exception:  # pragma: no cover - conservative (v7x-sized) fallback
        return 64 << 20


def _vmem_usage(bb, bl, input_dim, x_bytes, w_bytes, out_bytes, with_latent):
    """Live VMEM (double-buffered pipeline tiles + scratch), in bytes."""
    n = 2 * bb * input_dim * x_bytes          # x tile
    n += 2 * input_dim * bl * w_bytes         # W_enc slab
    n += 2 * bl * 4                           # folded encoder bias slab
    n += 2 * bl * input_dim * w_bytes         # W_dec slab
    n += 2 * input_dim * 4                    # decoder bias
    n += 2 * bb * input_dim * out_bytes       # reconstruction tile
    if with_latent:
        n += 2 * bb * bl * 4                  # latent tile
    else:
        n += bb * input_dim * 4               # f32 accumulator scratch
    return n


def _choose_tiles(b_pad0, l_pad0, input_dim, x_bytes, w_bytes, out_bytes,
                  with_latent, budget):
    """Pick (block_b, block_l).  block_b is maximized first (it sets the
    arithmetic intensity per streamed weight byte), then block_l."""
    bb_cands = {c for c in (1024, 768, 512, 384, 256, 128, 64, 32, 16, 8)
                if c <= b_pad0}
    if b_pad0 <= 1024:
        bb_cands.add(b_pad0)
    bl_cands = {c for c in (2048, 1024, 512, 256, 128) if c <= l_pad0}
    if l_pad0 <= 4096:
        bl_cands.add(l_pad0)
    bb_cands = sorted(bb_cands, reverse=True) or [b_pad0]
    bl_cands = sorted(bl_cands, reverse=True) or [l_pad0]
    for bb in bb_cands:
        for bl in bl_cands:
            if _vmem_usage(bb, bl, input_dim, x_bytes, w_bytes, out_bytes,
                           with_latent) <= budget:
                return bb, bl
    return bb_cands[-1], bl_cands[-1]


# --------------------------------------------------------------- wrapper ----

@functools.partial(
    jax.jit,
    static_argnames=("return_latent", "block_b", "block_l",
                     "use_bf16_weights"))
def autoencoder_forward(base, w_enc_t, b_enc, w_dec_t, b_dec,
                        return_latent=False, block_b=None, block_l=None,
                        use_bf16_weights=True):
    """Pallas-backed AutoencoderLayer.forward.

    base     : (B, input_dim)          -- any float dtype (bf16 typical)
    w_enc_t  : (input_dim, latent_dim) -- encoder weight, pre-transposed, f32
    b_enc    : (latent_dim,)           -- f32
    w_dec_t  : (latent_dim, input_dim) -- decoder weight, pre-transposed, f32
    b_dec    : (input_dim,)            -- f32
    """
    B, input_dim = base.shape
    latent_dim = w_enc_t.shape[1]
    base_dtype = base.dtype

    w_dtype = jnp.bfloat16 if use_bf16_weights else jnp.float32
    w_bytes = jnp.dtype(w_dtype).itemsize
    x_bytes = w_bytes
    out_bytes = 4 if return_latent else jnp.dtype(base_dtype).itemsize

    # ---- parameter prep (once per call, fused by XLA outside the kernel) ---
    # relu((x - b_dec) @ W + b) == relu(x @ W + (b - b_dec @ W))   (f32 algebra)
    b_enc_fold = (b_enc.astype(jnp.float32)
                  - b_dec.astype(jnp.float32) @ w_enc_t.astype(jnp.float32))
    w_enc_c = w_enc_t.astype(w_dtype)
    w_dec_c = w_dec_t.astype(w_dtype)
    x_in = base.astype(w_dtype)          # cast once here, not per latent slab
    b_dec2 = b_dec.astype(jnp.float32).reshape(1, input_dim)

    # ---- generation-aware tiling -------------------------------------------
    sub_align = 16 if w_bytes == 2 else 8
    b_pad0 = _round_up(B, sub_align)
    l_pad0 = _round_up(latent_dim, 128)
    cap = _vmem_capacity_bytes()
    budget = int(cap * 0.75)
    if block_b is None or block_l is None:
        bb_auto, bl_auto = _choose_tiles(
            b_pad0, l_pad0, input_dim, x_bytes, w_bytes, out_bytes,
            return_latent, budget)
        block_b = bb_auto if block_b is None else block_b
        block_l = bl_auto if block_l is None else block_l

    # Pad batch / latent so every tile is full (zero pads are inert:
    # padded weight cols/rows are zero -> padded latents are relu(0)=0 ->
    # zero decoder contribution; padded batch rows are sliced off).
    b_pad = _round_up(B, block_b)
    l_pad = _round_up(latent_dim, block_l)
    if b_pad != B:
        x_in = jnp.pad(x_in, ((0, b_pad - B), (0, 0)))
    if l_pad != latent_dim:
        pad_l = l_pad - latent_dim
        w_enc_c = jnp.pad(w_enc_c, ((0, 0), (0, pad_l)))
        b_enc_fold = jnp.pad(b_enc_fold, ((0, pad_l),))
        w_dec_c = jnp.pad(w_dec_c, ((0, pad_l), (0, 0)))
    b_enc_fold = b_enc_fold.reshape(1, l_pad)

    grid = (b_pad // block_b, l_pad // block_l)
    n_b_tiles = grid[0]

    in_specs = [
        pl.BlockSpec((block_b, input_dim), lambda i, j: (i, 0)),   # x tile
        pl.BlockSpec((input_dim, block_l), lambda i, j: (0, j)),   # W_enc slab
        pl.BlockSpec((1, block_l), lambda i, j: (0, j)),           # b_enc_fold
        pl.BlockSpec((block_l, input_dim), lambda i, j: (j, 0)),   # W_dec slab
        pl.BlockSpec((1, input_dim), lambda i, j: (0, 0)),         # b_dec
    ]
    out_spec_recon = pl.BlockSpec((block_b, input_dim), lambda i, j: (i, 0))

    usage = _vmem_usage(block_b, block_l, input_dim, x_bytes, w_bytes,
                        out_bytes, return_latent)
    vmem_limit = int(min(0.9 * cap, max(usage * 1.2 + (8 << 20), 48 << 20)))

    flops = 4 * b_pad * input_dim * l_pad            # two M*N*K matmuls
    bytes_accessed = (b_pad * input_dim * (x_bytes + out_bytes)
                      + n_b_tiles * 2 * input_dim * l_pad * w_bytes
                      + n_b_tiles * (l_pad + input_dim) * 4)
    if return_latent:
        bytes_accessed += b_pad * l_pad * 4
    cost = pl.CostEstimate(flops=int(flops), transcendentals=0,
                           bytes_accessed=int(bytes_accessed))

    cparams = pltpu.CompilerParams(
        dimension_semantics=("parallel", "arbitrary"),
        vmem_limit_bytes=vmem_limit)

    if not return_latent:
        # No latent HBM writeback at all on this (common) path.
        out = pl.pallas_call(
            _ae_kernel,
            out_shape=jax.ShapeDtypeStruct((b_pad, input_dim), base_dtype),
            grid_spec=pltpu.PrefetchScalarGridSpec(
                num_scalar_prefetch=0,
                grid=grid,
                in_specs=in_specs,
                out_specs=out_spec_recon,
                scratch_shapes=[pltpu.VMEM((block_b, input_dim), jnp.float32)]),
            compiler_params=cparams,
            cost_estimate=cost,
        )(x_in, w_enc_c, b_enc_fold, w_dec_c, b_dec2)
        if b_pad != B:
            out = out[:B]
        return out

    out, latent = pl.pallas_call(
        _ae_kernel_with_latent,
        out_shape=(
            jax.ShapeDtypeStruct((b_pad, input_dim), jnp.float32),  # 'output'
            jax.ShapeDtypeStruct((b_pad, l_pad), jnp.float32),      # 'latent'
        ),
        grid_spec=pltpu.PrefetchScalarGridSpec(
            num_scalar_prefetch=0,
            grid=grid,
            in_specs=in_specs,
            out_specs=[
                out_spec_recon,
                pl.BlockSpec((block_b, block_l), lambda i, j: (i, j)),
            ],
            scratch_shapes=[]),
        compiler_params=cparams,
        cost_estimate=cost,
    )(x_in, w_enc_c, b_enc_fold, w_dec_c, b_dec2)
    if b_pad != B or l_pad != latent_dim:
        out = out[:B]
        latent = latent[:B, :latent_dim]
    # PyTorch returns the reconstruction in the weight dtype here (no cast back).
    return {"latent": latent, "output": out}


# ------------------------------------------------------------ test harness --

def _init_params(key, input_dim, latent_dim):
    """Deterministic init mimicking torch.nn.Linear (uniform +-1/sqrt(fan_in))."""
    k1, k2, k3, k4 = jax.random.split(key, 4)
    lim_enc = 1.0 / (input_dim ** 0.5)
    lim_dec = 1.0 / (latent_dim ** 0.5)
    # Stored pre-transposed: (in_features, out_features).
    w_enc_t = jax.random.uniform(k1, (input_dim, latent_dim), jnp.float32,
                                 -lim_enc, lim_enc)
    b_enc = jax.random.uniform(k2, (latent_dim,), jnp.float32,
                               -lim_enc, lim_enc)
    w_dec_t = jax.random.uniform(k3, (latent_dim, input_dim), jnp.float32,
                                 -lim_dec, lim_dec)
    b_dec = jax.random.uniform(k4, (input_dim,), jnp.float32,
                               -lim_dec, lim_dec)
    return w_enc_t, b_enc, w_dec_t, b_dec


def _reference_forward(base, w_enc_t, b_enc, w_dec_t, b_dec):
    """Pure-JAX f32 reference matching the PyTorch forward."""
    x = base.astype(jnp.float32)
    x = x - b_dec
    latent = jnp.maximum(x @ w_enc_t + b_enc, 0.0)
    recon = latent @ w_dec_t + b_dec
    return recon, latent


if __name__ == "__main__":
    key = jax.random.PRNGKey(0)

    # ---- case 1/2: tidy shapes ---------------------------------------------
    B, INPUT_DIM, LATENT_DIM = 32, 256, 512
    k_x, k_p, k_x2, k_p2 = jax.random.split(key, 4)
    base = jax.random.normal(k_x, (B, INPUT_DIM), dtype=jnp.float32)
    base = base.astype(jnp.bfloat16)
    w_enc_t, b_enc, w_dec_t, b_dec = _init_params(k_p, INPUT_DIM, LATENT_DIM)

    ref_out, ref_lat = _reference_forward(base, w_enc_t, b_enc, w_dec_t, b_dec)

    # 1) Auto (VMEM-capacity-aware) tiling, reconstruction only.
    out = autoencoder_forward(base, w_enc_t, b_enc, w_dec_t, b_dec)
    out = jax.block_until_ready(out)
    assert out.dtype == base.dtype and out.shape == (B, INPUT_DIM)
    err = jnp.max(jnp.abs(out.astype(jnp.float32) - ref_out))
    assert float(err) < 6e-2, f"output mismatch (auto tiling): {err}"

    # 2) Explicit multi-tile grid: exercises the latent-reduction accumulation
    #    (directly into the f32 output block) and the latent writeback path.
    res = autoencoder_forward(base, w_enc_t, b_enc, w_dec_t, b_dec,
                              return_latent=True, block_b=16, block_l=128)
    res = jax.block_until_ready(res)
    assert res["output"].dtype == jnp.float32
    assert res["output"].shape == (B, INPUT_DIM)
    assert res["latent"].shape == (B, LATENT_DIM)
    err_o = jnp.max(jnp.abs(res["output"] - ref_out))
    err_l = jnp.max(jnp.abs(res["latent"] - ref_lat))
    assert float(err_o) < 6e-2, f"output mismatch (tiled): {err_o}"
    assert float(err_l) < 6e-2, f"latent mismatch: {err_l}"

    # ---- case 3: awkward shapes (exercise the padding path) -----------------
    B3, IN3, LAT3 = 20, 128, 320   # B not a multiple of 16, latent not of 128
    base3 = jax.random.normal(k_x2, (B3, IN3), dtype=jnp.float32)
    base3 = base3.astype(jnp.bfloat16)
    p3 = _init_params(k_p2, IN3, LAT3)
    ref_out3, ref_lat3 = _reference_forward(base3, *p3)
    res3 = autoencoder_forward(base3, *p3, return_latent=True)
    res3 = jax.block_until_ready(res3)
    assert res3["output"].shape == (B3, IN3)
    assert res3["latent"].shape == (B3, LAT3)
    err_o3 = jnp.max(jnp.abs(res3["output"] - ref_out3))
    err_l3 = jnp.max(jnp.abs(res3["latent"] - ref_lat3))
    assert float(err_o3) < 6e-2, f"output mismatch (padded): {err_o3}"
    assert float(err_l3) < 6e-2, f"latent mismatch (padded): {err_l3}"

    print("KERNEL_OK")
</pallas_src>

<mosaic_0001>
module attributes {stable_mosaic.version = 11 : i64} {
  func.func @_ae_kernel(%arg0: i32, %arg1: i32, %arg2: memref<32x256xbf16, #tpu.memory_space<vmem>>, %arg3: memref<256x512xbf16, #tpu.memory_space<vmem>>, %arg4: memref<1x512xf32, #tpu.memory_space<vmem>>, %arg5: memref<512x256xbf16, #tpu.memory_space<vmem>>, %arg6: memref<1x256xf32, #tpu.memory_space<vmem>>, %arg7: memref<32x256xbf16, #tpu.memory_space<vmem>>, %arg8: memref<32x256xf32, #tpu.memory_space<vmem>>) attributes {dimension_semantics = [#tpu.dimension_semantics<parallel>, #tpu.dimension_semantics<arbitrary>], iteration_bounds = array<i64: 1, 1>, scalar_prefetch = 0 : i64, scratch_operands = 1 : i64, tpu.core_type = #tpu.core_type<tc>, window_params = [{transform_indices = @transform_0, window_bounds = array<i64: 32, 256>}, {transform_indices = @transform_1, window_bounds = array<i64: 256, 512>}, {transform_indices = @transform_2, window_bounds = array<i64: 1, 512>}, {transform_indices = @transform_3, window_bounds = array<i64: 512, 256>}, {pipeline_mode = #tpu.pipeline_mode<synchronous>, transform_indices = @transform_4, window_bounds = array<i64: 1, 256>}, {transform_indices = @transform_5, window_bounds = array<i64: 32, 256>}]} {
    %c0 = arith.constant 0 : index
    %c0_0 = arith.constant 0 : index
    %0 = vector.load %arg2[%c0, %c0_0] : memref<32x256xbf16, #tpu.memory_space<vmem>>, vector<32x256xbf16>
    %c0_1 = arith.constant 0 : index
    %c0_2 = arith.constant 0 : index
    %1 = vector.load %arg3[%c0_1, %c0_2] : memref<256x512xbf16, #tpu.memory_space<vmem>>, vector<256x512xbf16>
    %cst = arith.constant dense<0.000000e+00> : vector<32x512xf32>
    %2 = tpu.matmul %0, %1, %cst {dimension_numbers = #tpu.dot_dimension_numbers<[1], [0], [0], [1], [0, 0, 1, 1], [], []>} : vector<32x256xbf16>, vector<256x512xbf16>, vector<32x512xf32> -> vector<32x512xf32>
    %c0_3 = arith.constant 0 : index
    %c0_4 = arith.constant 0 : index
    %3 = vector.load %arg4[%c0_3, %c0_4] : memref<1x512xf32, #tpu.memory_space<vmem>>, vector<1x512xf32>
    %4 = vector.broadcast %3 : vector<1x512xf32> to vector<32x512xf32>
    %5 = arith.addf %2, %4 : vector<32x512xf32>
    %cst_5 = arith.constant 0.000000e+00 : f32
    %6 = vector.broadcast %cst_5 : f32 to vector<32x512xf32>
    %7 = arith.maximumf %5, %6 : vector<32x512xf32>
    %8 = arith.truncf %7 : vector<32x512xf32> to vector<32x512xbf16>
    %c0_6 = arith.constant 0 : index
    %c0_7 = arith.constant 0 : index
    %9 = vector.load %arg5[%c0_6, %c0_7] : memref<512x256xbf16, #tpu.memory_space<vmem>>, vector<512x256xbf16>
    %cst_8 = arith.constant dense<0.000000e+00> : vector<32x256xf32>
    %10 = tpu.matmul %8, %9, %cst_8 {dimension_numbers = #tpu.dot_dimension_numbers<[1], [0], [0], [1], [0, 0, 1, 1], [], []>} : vector<32x512xbf16>, vector<512x256xbf16>, vector<32x256xf32> -> vector<32x256xf32>
    %c0_i32 = arith.constant 0 : i32
    %11 = arith.cmpi eq, %arg1, %c0_i32 : i32
    %12 = arith.extui %11 : i1 to i32
    %c0_i32_9 = arith.constant 0 : i32
    %13 = arith.cmpi ne, %12, %c0_i32_9 : i32
    scf.if %13 {
      %c0_14 = arith.constant 0 : index
      %c0_15 = arith.constant 0 : index
      %20 = vector.load %arg8[%c0_14, %c0_15] : memref<32x256xf32, #tpu.memory_space<vmem>>, vector<32x256xf32>
      tpu.vector_store %arg8[%c0_14, %c0_15], %10 {strides = array<i32>} : memref<32x256xf32, #tpu.memory_space<vmem>>, vector<32x256xf32>,
    } else {
    }
    %c0_i32_10 = arith.constant 0 : i32
    %14 = arith.cmpi sgt, %arg1, %c0_i32_10 : i32
    %15 = arith.extui %14 : i1 to i32
    %c0_i32_11 = arith.constant 0 : i32
    %16 = arith.cmpi ne, %15, %c0_i32_11 : i32
    scf.if %16 {
      %c0_14 = arith.constant 0 : index
      %c0_15 = arith.constant 0 : index
      %20 = vector.load %arg8[%c0_14, %c0_15] : memref<32x256xf32, #tpu.memory_space<vmem>>, vector<32x256xf32>
      %21 = arith.addf %20, %10 : vector<32x256xf32>
      %c0_16 = arith.constant 0 : index
      %c0_17 = arith.constant 0 : index
      %22 = vector.load %arg8[%c0_16, %c0_17] : memref<32x256xf32, #tpu.memory_space<vmem>>, vector<32x256xf32>
      tpu.vector_store %arg8[%c0_16, %c0_17], %21 {strides = array<i32>} : memref<32x256xf32, #tpu.memory_space<vmem>>, vector<32x256xf32>,
    } else {
    }
    %c0_i32_12 = arith.constant 0 : i32
    %17 = arith.cmpi eq, %arg1, %c0_i32_12 : i32
    %18 = arith.extui %17 : i1 to i32
    %c0_i32_13 = arith.constant 0 : i32
    %19 = arith.cmpi ne, %18, %c0_i32_13 : i32
    scf.if %19 {
      %c0_14 = arith.constant 0 : index
      %c0_15 = arith.constant 0 : index
      %20 = vector.load %arg8[%c0_14, %c0_15] : memref<32x256xf32, #tpu.memory_space<vmem>>, vector<32x256xf32>
      %c0_16 = arith.constant 0 : index
      %c0_17 = arith.constant 0 : index
      %21 = vector.load %arg6[%c0_16, %c0_17] : memref<1x256xf32, #tpu.memory_space<vmem>>, vector<1x256xf32>
      %22 = vector.broadcast %21 : vector<1x256xf32> to vector<32x256xf32>
      %23 = arith.addf %20, %22 : vector<32x256xf32>
      %24 = arith.truncf %23 : vector<32x256xf32> to vector<32x256xbf16>
      %c0_18 = arith.constant 0 : index
      %c0_19 = arith.constant 0 : index
      %25 = vector.load %arg7[%c0_18, %c0_19] : memref<32x256xbf16, #tpu.memory_space<vmem>>, vector<32x256xbf16>
      tpu.vector_store %arg7[%c0_18, %c0_19], %24 {strides = array<i32>} : memref<32x256xbf16, #tpu.memory_space<vmem>>, vector<32x256xbf16>,
    } else {
    }
    return
  }
  func.func @transform_0(%arg0: i32, %arg1: i32) -> (i32, i32) {
    %c0_i32 = arith.constant 0 : i32
    %c0_i32_0 = arith.constant 0 : i32
    return %arg0, %c0_i32 : i32, i32
  }
  func.func @transform_1(%arg0: i32, %arg1: i32) -> (i32, i32) {
    %c0_i32 = arith.constant 0 : i32
    %c0_i32_0 = arith.constant 0 : i32
    return %c0_i32, %arg1 : i32, i32
  }
  func.func @transform_2(%arg0: i32, %arg1: i32) -> (i32, i32) {
    %c0_i32 = arith.constant 0 : i32
    %c0_i32_0 = arith.constant 0 : i32
    return %c0_i32, %arg1 : i32, i32
  }
  func.func @transform_3(%arg0: i32, %arg1: i32) -> (i32, i32) {
    %c0_i32 = arith.constant 0 : i32
    %c0_i32_0 = arith.constant 0 : i32
    return %arg1, %c0_i32 : i32, i32
  }
  func.func @transform_4(%arg0: i32, %arg1: i32) -> (i32, i32) {
    %c0_i32 = arith.constant 0 : i32
    %c0_i32_0 = arith.constant 0 : i32
    %c0_i32_1 = arith.constant 0 : i32
    return %c0_i32, %c0_i32_0 : i32, i32
  }
  func.func @transform_5(%arg0: i32, %arg1: i32) -> (i32, i32) {
    %c0_i32 = arith.constant 0 : i32
    %c0_i32_0 = arith.constant 0 : i32
    return %arg0, %c0_i32 : i32, i32
  }
}

</mosaic_0001>

<bundles_post_ra>
// kernel: sub.1
= control target key start
LH: loop header
LB: loop body
LE: loop exit
PB: predicated region body
PF: predicated region fallthrough
CT: control target
= control target key end

     0   :  { %s34_s0 = inlined_call_operand.vmem [shape: f32[512], index: 0, kind: input, shape index: {}]   ;;  %s35_s1 = inlined_call_operand.vmem [shape: f32[512], index: 1, kind: input, shape index: {}]   ;;  %s36_s2 = inlined_call_operand.vmem [shape: f32[512], index: 2, kind: output, shape index: {}]  }
   0x1   :  { %v3_v0 = vld [vmem:[%s34_s0] sm:$0xf] }
   0x2   :  { %v4_v1 = vld [vmem:[%s35_s1] sm:$0xf] }
   0x3   :  { %v7_v2 = vsub.f32 %v3_v0, %v4_v1 }
   0x5   :  { %9 = vst [vmem:[%s36_s2] sm:$0xf] %v7_v2 }

// kernel: autoencoder_forward.1
= control target key start
LH: loop header
LB: loop body
LE: loop exit
PB: predicated region body
PF: predicated region fallthrough
CT: control target
= control target key end

     0   :  { %s2835_s0 = inlined_call_operand.vmem [shape: bf16[32,256], index: 0, kind: input, shape index: {}]   ;;  %s2836_s1 = inlined_call_operand.vmem [shape: bf16[256,512], index: 1, kind: input, shape index: {}]   ;;  %s2837_s2 = inlined_call_operand.vmem [shape: f32[1,512], index: 2, kind: input, shape index: {}]   ;;  %s2838_s3 = inlined_call_operand.vmem [shape: bf16[512,256], index: 3, kind: input, shape index: {}]   ;;  %s2839_s4 = inlined_call_operand.vmem [shape: f32[1,256], index: 4, kind: input, shape index: {}]   ;;  %s2840_s5 = inlined_call_operand.hbm [shape: bf16[32,256], index: 5, kind: output, shape index: {}]  }
   0x1   :  { %v1372_v0 = vld [vmem:[%s2836_s1 + $0xe0] sm:$0xf]  ;;  %v1804_v1 = vld [vmem:[%s2836_s1 + $0xec] sm:$0xf0]  ;;  %v1802_v5 = vld [vmem:[%s2836_s1 + $0xe4] sm:$0xf] }
   0x2   :  { %v1500_v2 = vld [vmem:[%s2836_s1 + $0x1e0] sm:$0xf]  ;;  %v1373_v3 = vor.u32 %v1804_v1, %v1372_v0  ;;  %v1836_v4 = vld [vmem:[%s2836_s1 + $0x1ec] sm:$0xf0]  ;;  %v1374_v6 = vld [vmem:[%s2836_s1 + $0xf0] sm:$0xf0] }
   0x3   :  { %v1501_v7 = vor.u32 %v1836_v4, %v1500_v2  ;;  %v1377_v8 = vor.u32 %v1802_v5, %v1374_v6  ;;  %v1834_v9 = vld [vmem:[%s2836_s1 + $0x1e4] sm:$0xf]  ;;  %v1502_v10 = vld [vmem:[%s2836_s1 + $0x1f0] sm:$0xf0]  ;;  %v1356_v11 = vld [vmem:[%s2836_s1 + $0xc0] sm:$0xf] }
   0x4   :  { %439 = vmatpush.bf16.msra.mxu0 %v1373_v3  ;;  %v1505_v12 = vor.u32 %v1834_v9, %v1502_v10  ;;  %v1800_v13 = vld [vmem:[%s2836_s1 + $0xcc] sm:$0xf0]  ;;  %v1484_v14 = vld [vmem:[%s2836_s1 + $0x1c0] sm:$0xf]  ;;  %v1798_v18 = vld [vmem:[%s2836_s1 + $0xc4] sm:$0xf] }
   0x5   :  { %v1832_v15 = vld [vmem:[%s2836_s1 + $0x1cc] sm:$0xf0]  ;;  %458 = vmatpush.bf16.msra.mxu1 %v1501_v7  ;;  %477 = vmatpush.bf16.msra.mxu2 %v1377_v8  ;;  %v1357_v16 = vor.u32 %v1800_v13, %v1356_v11  ;;  %v1358_v19 = vld [vmem:[%s2836_s1 + $0xd0] sm:$0xf0]  ;;  %v1830_v20 = vld [vmem:[%s2836_s1 + $0x1c4] sm:$0xf] }
   0x6   :  { %v1485_v17 = vor.u32 %v1832_v15, %v1484_v14  ;;  %496 = vmatpush.bf16.msra.mxu3 %v1505_v12  ;;  %v1361_v21 = vor.u32 %v1798_v18, %v1358_v19  ;;  %v1486_v22 = vld [vmem:[%s2836_s1 + $0x1d0] sm:$0xf0]  ;;  %v1340_v23 = vld [vmem:[%s2836_s1 + $0xa0] sm:$0xf]  ;;  %v1796_v24 = vld [vmem:[%s2836_s1 + $0xac] sm:$0xf0] }
   0x7   :  { %v1489_v25 = vor.u32 %v1830_v20, %v1486_v22  ;;  %v1468_v26 = vld [vmem:[%s2836_s1 + $0x1a0] sm:$0xf]  ;;  %v1828_v27 = vld [vmem:[%s2836_s1 + $0x1ac] sm:$0xf0]  ;;  %v1794_v28 = vld [vmem:[%s2836_s1 + $0xa4] sm:$0xf]  ;;  %v1341_v29 = vor.u32 %v1796_v24, %v1340_v23 }
   0x8   :  { %440 = vmatpush.bf16.msra.mxu0 %v1357_v16  ;;  %v1342_v30 = vld [vmem:[%s2836_s1 + $0xb0] sm:$0xf0]  ;;  %v1826_v31 = vld [vmem:[%s2836_s1 + $0x1a4] sm:$0xf]  ;;  %v1469_v33 = vor.u32 %v1828_v27, %v1468_v26  ;;  %v1324_v35 = vld [vmem:[%s2836_s1 + $0x80] sm:$0xf] }
   0x9   :  { %v1470_v32 = vld [vmem:[%s2836_s1 + $0x1b0] sm:$0xf0]  ;;  %459 = vmatpush.bf16.msra.mxu1 %v1485_v17  ;;  %478 = vmatpush.bf16.msra.mxu2 %v1361_v21  ;;  %v1345_v34 = vor.u32 %v1794_v28, %v1342_v30  ;;  %v1792_v36 = vld [vmem:[%s2836_s1 + $0x8c] sm:$0xf0]  ;;  %v1452_v37 = vld [vmem:[%s2836_s1 + $0x180] sm:$0xf] }
   0xa   :  { %497 = vmatpush.bf16.msra.mxu3 %v1489_v25  ;;  %v1473_v38 = vor.u32 %v1826_v31, %v1470_v32  ;;  %v1824_v39 = vld [vmem:[%s2836_s1 + $0x18c] sm:$0xf0]  ;;  %v1790_v40 = vld [vmem:[%s2836_s1 + $0x84] sm:$0xf]  ;;  %v1326_v41 = vld [vmem:[%s2836_s1 + $0x90] sm:$0xf0]  ;;  %v1325_v44 = vor.u32 %v1792_v36, %v1324_v35 }
   0xb   :  { %v1822_v42 = vld [vmem:[%s2836_s1 + $0x184] sm:$0xf]  ;;  %v1454_v43 = vld [vmem:[%s2836_s1 + $0x190] sm:$0xf0]  ;;  %v1453_v45 = vor.u32 %v1824_v39, %v1452_v37  ;;  %v1329_v46 = vor.u32 %v1790_v40, %v1326_v41  ;;  %v1308_v47 = vld [vmem:[%s2836_s1 + $0x60] sm:$0xf] }
   0xc   :  { %441 = vmatpush.bf16.msra.mxu0 %v1341_v29  ;;  %v1788_v48 = vld [vmem:[%s2836_s1 + $0x6c] sm:$0xf0]  ;;  %v1436_v49 = vld [vmem:[%s2836_s1 + $0x160] sm:$0xf]  ;;  %v1457_v50 = vor.u32 %v1822_v42, %v1454_v43  ;;  %v1786_v52 = vld [vmem:[%s2836_s1 + $0x64] sm:$0xf] }
   0xd   :  { %460 = vmatpush.bf16.msra.mxu1 %v1469_v33  ;;  %479 = vmatpush.bf16.msra.mxu2 %v1345_v34  ;;  %v1820_v51 = vld [vmem:[%s2836_s1 + $0x16c] sm:$0xf0]  ;;  %v1310_v53 = vld [vmem:[%s2836_s1 + $0x70] sm:$0xf0]  ;;  %v1818_v54 = vld [vmem:[%s2836_s1 + $0x164] sm:$0xf]  ;;  %v1309_v56 = vor.u32 %v1788_v48, %v1308_v47 }
   0xe   :  { %498 = vmatpush.bf16.msra.mxu3 %v1473_v38  ;;  %v1438_v55 = vld [vmem:[%s2836_s1 + $0x170] sm:$0xf0]  ;;  %v1437_v57 = vor.u32 %v1820_v51, %v1436_v49  ;;  %v1313_v58 = vor.u32 %v1786_v52, %v1310_v53  ;;  %v1292_v59 = vld [vmem:[%s2836_s1 + $0x40] sm:$0xf]  ;;  %v1784_v60 = vld [vmem:[%s2836_s1 + $0x4c] sm:$0xf0] }
   0xf   :  { %v1420_v61 = vld [vmem:[%s2836_s1 + $0x140] sm:$0xf]  ;;  %v1441_v62 = vor.u32 %v1818_v54, %v1438_v55  ;;  %v1816_v63 = vld [vmem:[%s2836_s1 + $0x14c] sm:$0xf0]  ;;  %v1782_v0 = vld [vmem:[%s2836_s1 + $0x44] sm:$0xf]  ;;  %v1293_v4 = vor.u32 %v1784_v60, %v1292_v59 }
  0x10   :  { %442 = vmatpush.bf16.msra.mxu0 %v1325_v44  ;;  %v1294_v1 = vld [vmem:[%s2836_s1 + $0x50] sm:$0xf0]  ;;  %v1814_v2 = vld [vmem:[%s2836_s1 + $0x144] sm:$0xf]  ;;  %v1421_v5 = vor.u32 %v1816_v63, %v1420_v61  ;;  %v1276_v7 = vld [vmem:[%s2836_s1 + $0x20] sm:$0xf] }
  0x11   :  { %461 = vmatpush.bf16.msra.mxu1 %v1453_v45  ;;  %480 = vmatpush.bf16.msra.mxu2 %v1329_v46  ;;  %v1422_v3 = vld [vmem:[%s2836_s1 + $0x150] sm:$0xf0]  ;;  %v1297_v6 = vor.u32 %v1782_v0, %v1294_v1  ;;  %v1780_v8 = vld [vmem:[%s2836_s1 + $0x2c] sm:$0xf0]  ;;  %v1404_v9 = vld [vmem:[%s2836_s1 + $0x120] sm:$0xf] }
  0x12   :  { %499 = vmatpush.bf16.msra.mxu3 %v1457_v50  ;;  %v1425_v10 = vor.u32 %v1814_v2, %v1422_v3  ;;  %v1812_v11 = vld [vmem:[%s2836_s1 + $0x12c] sm:$0xf0]  ;;  %v1778_v12 = vld [vmem:[%s2836_s1 + $0x24] sm:$0xf]  ;;  %v1278_v13 = vld [vmem:[%s2836_s1 + $0x30] sm:$0xf0]  ;;  %v1277_v16 = vor.u32 %v1780_v8, %v1276_v7 }
  0x13   :  { %v1810_v14 = vld [vmem:[%s2836_s1 + $0x124] sm:$0xf]  ;;  %v1406_v15 = vld [vmem:[%s2836_s1 + $0x130] sm:$0xf0]  ;;  %v1260_v17 = vld [vmem:[%s2836_s1] sm:$0xf]  ;;  %v1405_v19 = vor.u32 %v1812_v11, %v1404_v9  ;;  %v1281_v20 = vor.u32 %v1778_v12, %v1278_v13 }
  0x14   :  { %443 = vmatpush.bf16.msra.mxu0 %v1309_v56  ;;  %v1776_v18 = vld [vmem:[%s2836_s1 + $0xc] sm:$0xf0]  ;;  %v1388_v21 = vld [vmem:[%s2836_s1 + $0x100] sm:$0xf]  ;;  %v1774_v23 = vld [vmem:[%s2836_s1 + $0x4] sm:$0xf]  ;;  %v1409_v24 = vor.u32 %v1810_v14, %v1406_v15 }
  0x15   :  { %462 = vmatpush.bf16.msra.mxu1 %v1437_v57  ;;  %481 = vmatpush.bf16.msra.mxu2 %v1313_v58  ;;  %v1808_v22 = vld [vmem:[%s2836_s1 + $0x10c] sm:$0xf0]  ;;  %v1262_v25 = vld [vmem:[%s2836_s1 + $0x10] sm:$0xf0]  ;;  %v1806_v26 = vld [vmem:[%s2836_s1 + $0x104] sm:$0xf]  ;;  %v1261_v31 = vor.u32 %v1776_v18, %v1260_v17 }
  0x16   :  { %500 = vmatpush.bf16.msra.mxu3 %v1441_v62  ;;  %v1390_v27 = vld [vmem:[%s2836_s1 + $0x110] sm:$0xf0]  ;;  %v1244_v28 = vld [vmem:[%s2835_s0] sm:$0xf]  ;;  %v1803_v29 = vld [vmem:[%s2836_s1 + $0xec] sm:$0xf]  ;;  %v1389_v35 = vor.u32 %v1808_v22, %v1388_v21  ;;  %v1265_v36 = vor.u32 %v1774_v23, %v1262_v25 }
  0x17   :  { %v1382_v30 = vld [vmem:[%s2836_s1 + $0xf8] sm:$0xf0]  ;;  %v1771_v32 = vld [vmem:[%s2835_s0 + $0x4] sm:$0xf0]  ;;  %v1837_v34 = vld [vmem:[%s2836_s1 + $0x1f4] sm:$0xf0]  ;;  %v1393_v39 = vor.u32 %v1806_v26, %v1390_v27 }
  0x18   :  { %444 = vmatpush.bf16.msra.mxu0 %v1293_v4  ;;  %v1508_v33 = vld [vmem:[%s2836_s1 + $0x1e8] sm:$0xf]  ;;  %v1770_v37 = vld [vmem:[%s2835_s0 + $0x4] sm:$0xf]  ;;  %v1246_v38 = vld [vmem:[%s2835_s0 + $0x8] sm:$0xf0]  ;;  %v1385_v40 = vor.u32 %v1803_v29, %v1382_v30  ;;  %v2189_v44 = vor.u32 %v1771_v32, %v1244_v28 }
  0x19   :  { %463 = vmatpush.bf16.msra.mxu1 %v1421_v5  ;;  %482 = vmatpush.bf16.msra.mxu2 %v1297_v6  ;;  %v1380_v41 = vld [vmem:[%s2836_s1 + $0xe8] sm:$0xf]  ;;  %v1805_v42 = vld [vmem:[%s2836_s1 + $0xf4] sm:$0xf0]  ;;  %v1835_v43 = vld [vmem:[%s2836_s1 + $0x1ec] sm:$0xf]  ;;  %v1509_v45 = vor.u32 %v1837_v34, %v1508_v33  ;;  %v2200_v49 = vor.u32 %v1770_v37, %v1246_v38 }
  0x1a   :  { %501 = vmatpush.bf16.msra.mxu3 %v1425_v10  ;;  %v1510_v46 = vld [vmem:[%s2836_s1 + $0x1f8] sm:$0xf0]  ;;  %v1799_v47 = vld [vmem:[%s2836_s1 + $0xcc] sm:$0xf]  ;;  %v1492_v50 = vld [vmem:[%s2836_s1 + $0x1c8] sm:$0xf]  ;;  %v1381_v52 = vor.u32 %v1805_v42, %v1380_v41 }
  0x1b   :  { %v1366_v48 = vld [vmem:[%s2836_s1 + $0xd8] sm:$0xf0]  ;;  %v1833_v51 = vld [vmem:[%s2836_s1 + $0x1d4] sm:$0xf0]  ;;  %v1513_v53 = vor.u32 %v1835_v43, %v1510_v46  ;;  %v1364_v55 = vld [vmem:[%s2836_s1 + $0xc8] sm:$0xf] }
  0x1c   :  { %445 = vmatpush.bf16.msra.mxu0 %v1277_v16  ;;  %v1369_v54 = vor.u32 %v1799_v47, %v1366_v48  ;;  %v1801_v56 = vld [vmem:[%s2836_s1 + $0xd4] sm:$0xf0]  ;;  %v1831_v57 = vld [vmem:[%s2836_s1 + $0x1cc] sm:$0xf]  ;;  %v1493_v58 = vor.u32 %v1833_v51, %v1492_v50  ;;  %v1494_v59 = vld [vmem:[%s2836_s1 + $0x1d8] sm:$0xf0] }
  0x1d   :  { %464 = vmatpush.bf16.msra.mxu1 %v1405_v19  ;;  %483 = vmatpush.bf16.msra.mxu2 %v1281_v20  ;;  %v1795_v60 = vld [vmem:[%s2836_s1 + $0xac] sm:$0xf]  ;;  %v1350_v61 = vld [vmem:[%s2836_s1 + $0xb8] sm:$0xf0]  ;;  %v1476_v62 = vld [vmem:[%s2836_s1 + $0x1a8] sm:$0xf]  ;;  %v1365_v0 = vor.u32 %v1801_v56, %v1364_v55  ;;  %v1497_v1 = vor.u32 %v1831_v57, %v1494_v59 }
  0x1e   :  { %502 = vmatpush.bf16.msra.mxu3 %v1409_v24  ;;  %v1829_v63 = vld [vmem:[%s2836_s1 + $0x1b4] sm:$0xf0]  ;;  %v1353_v2 = vor.u32 %v1795_v60, %v1350_v61  ;;  %v1348_v3 = vld [vmem:[%s2836_s1 + $0xa8] sm:$0xf]  ;;  %v1827_v5 = vld [vmem:[%s2836_s1 + $0x1ac] sm:$0xf] }
  0x1f   :  { %v1797_v4 = vld [vmem:[%s2836_s1 + $0xb4] sm:$0xf0]  ;;  %v1477_v6 = vor.u32 %v1829_v63, %v1476_v62  ;;  %v1478_v7 = vld [vmem:[%s2836_s1 + $0x1b8] sm:$0xf0]  ;;  %v1791_v8 = vld [vmem:[%s2836_s1 + $0x8c] sm:$0xf] }
  0x20   :  { %446 = vmatpush.bf16.msra.mxu0 %v1261_v31  ;;  %v1334_v9 = vld [vmem:[%s2836_s1 + $0x98] sm:$0xf0]  ;;  %v1460_v10 = vld [vmem:[%s2836_s1 + $0x188] sm:$0xf]  ;;  %v1825_v11 = vld [vmem:[%s2836_s1 + $0x194] sm:$0xf0]  ;;  %v1349_v12 = vor.u32 %v1797_v4, %v1348_v3  ;;  %v1481_v14 = vor.u32 %v1827_v5, %v1478_v7 }
  0x21   :  { %465 = vmatpush.bf16.msra.mxu1 %v1389_v35  ;;  %484 = vmatpush.bf16.msra.mxu2 %v1265_v36  ;;  %v1332_v13 = vld [vmem:[%s2836_s1 + $0x88] sm:$0xf]  ;;  %v1337_v15 = vor.u32 %v1791_v8, %v1334_v9  ;;  %v1793_v16 = vld [vmem:[%s2836_s1 + $0x94] sm:$0xf0]  ;;  %v1823_v17 = vld [vmem:[%s2836_s1 + $0x18c] sm:$0xf]  ;;  %v1461_v19 = vor.u32 %v1825_v11, %v1460_v10 }
  0x22   :  { %503 = vmatpush.bf16.msra.mxu3 %v1393_v39  ;;  %v1462_v18 = vld [vmem:[%s2836_s1 + $0x198] sm:$0xf0]  ;;  %v1252_v20 = vld [vmem:[%s2835_s0 + $0x10] sm:$0xf]  ;;  %v1787_v21 = vld [vmem:[%s2836_s1 + $0x6c] sm:$0xf]  ;;  %v1333_v26 = vor.u32 %v1793_v16, %v1332_v13 }
  0x23   :  { %447 = vmatmul.bf16.vlgmr.msra.gmra.mxu0 %v2189_v44  ;;  %v1318_v22 = vld [vmem:[%s2836_s1 + $0x78] sm:$0xf0]  ;;  %v1773_v23 = vld [vmem:[%s2835_s0 + $0x14] sm:$0xf0]  ;;  %v1444_v24 = vld [vmem:[%s2836_s1 + $0x168] sm:$0xf]  ;;  %v1465_v30 = vor.u32 %v1823_v17, %v1462_v18 }
  0x24   :  { %466 = vmatmul.bf16.vlgmr.msra.gmra.mxu1 %v2200_v49  ;;  %485 = vmatmul.bf16.vlgmr.msra.gmra.mxu2 %v2189_v44  ;;  %v1821_v25 = vld [vmem:[%s2836_s1 + $0x174] sm:$0xf0]  ;;  %v1772_v27 = vld [vmem:[%s2835_s0 + $0x14] sm:$0xf]  ;;  %v1254_v28 = vld [vmem:[%s2835_s0 + $0x18] sm:$0xf0]  ;;  %v1321_v31 = vor.u32 %v1787_v21, %v1318_v22 }
  0x25   :  { %553 = vmatpush.bf16.msrb.mxu2 %v1385_v40  ;;  %534 = vmatpush.bf16.msrb.mxu1 %v1509_v45  ;;  %v1316_v29 = vld [vmem:[%s2836_s1 + $0x68] sm:$0xf]  ;;  %v1789_v32 = vld [vmem:[%s2836_s1 + $0x74] sm:$0xf0]  ;;  %v1819_v33 = vld [vmem:[%s2836_s1 + $0x16c] sm:$0xf] }
  0x26   :  { %504 = vmatmul.bf16.vlgmr.msra.gmra.mxu3 %v2200_v49  ;;  %515 = vmatpush.bf16.msrb.mxu0 %v1381_v52 }
  0x27   :  { %572 = vmatpush.bf16.msrb.mxu3 %v1513_v53 }
  0x29   :  { %554 = vmatpush.bf16.msrb.mxu2 %v1369_v54  ;;  %535 = vmatpush.bf16.msrb.mxu1 %v1493_v58 }
  0x2a   :  { %516 = vmatpush.bf16.msrb.mxu0 %v1365_v0 }
  0x2b   :  { %573 = vmatpush.bf16.msrb.mxu3 %v1497_v1 }
  0x2d   :  { %555 = vmatpush.bf16.msrb.mxu2 %v1353_v2  ;;  %536 = vmatpush.bf16.msrb.mxu1 %v1477_v6 }
  0x2e   :  { %517 = vmatpush.bf16.msrb.mxu0 %v1349_v12 }
  0x2f   :  { %574 = vmatpush.bf16.msrb.mxu3 %v1481_v14 }
  0x31   :  { %556 = vmatpush.bf16.msrb.mxu2 %v1337_v15 }
  0x32   :  { %10 = vsyncpa [#allocation4], 0  ;;  %537 = vmatpush.bf16.msrb.mxu1 %v1461_v19  ;;  %v2305_v34 = vor.u32 %v1773_v23, %v1252_v20  ;;  %v1445_v35 = vor.u32 %v1821_v25, %v1444_v24  ;;  %v1446_v36 = vld [vmem:[%s2836_s1 + $0x178] sm:$0xf0]  ;;  %v1783_v37 = vld [vmem:[%s2836_s1 + $0x4c] sm:$0xf]  ;;  %v2316_v39 = vor.u32 %v1772_v27, %v1254_v28  ;;  %518 = vmatpush.bf16.msrb.mxu0 %v1333_v26 }
  0x33   :  { %v1302_v38 = vld [vmem:[%s2836_s1 + $0x58] sm:$0xf0]  ;;  %v1428_v40 = vld [vmem:[%s2836_s1 + $0x148] sm:$0xf]  ;;  %v1817_v41 = vld [vmem:[%s2836_s1 + $0x154] sm:$0xf0]  ;;  %v1317_v42 = vor.u32 %v1789_v32, %v1316_v29  ;;  %575 = vmatpush.bf16.msrb.mxu3 %v1465_v30  ;;  %v1449_v43 = vor.u32 %v1819_v33, %v1446_v36 }
  0x34   :  { %v1305_v45 = vor.u32 %v1783_v37, %v1302_v38  ;;  %v1300_v46 = vld [vmem:[%s2836_s1 + $0x48] sm:$0xf]  ;;  %v1785_v47 = vld [vmem:[%s2836_s1 + $0x54] sm:$0xf0]  ;;  %v1815_v48 = vld [vmem:[%s2836_s1 + $0x14c] sm:$0xf]  ;;  %452 = vmatmul.bf16.gmra.mxu0 %v2305_v34  ;;  %v1429_v50 = vor.u32 %v1817_v41, %v1428_v40  ;;  %471 = vmatmul.bf16.gmra.mxu1 %v2316_v39 }
  0x35   :  { %557 = vmatpush.bf16.msrb.mxu2 %v1321_v31  ;;  %v1430_v51 = vld [vmem:[%s2836_s1 + $0x158] sm:$0xf0]  ;;  %v1779_v52 = vld [vmem:[%s2836_s1 + $0x2c] sm:$0xf]  ;;  %v1412_v54 = vld [vmem:[%s2836_s1 + $0x128] sm:$0xf]  ;;  %v1301_v56 = vor.u32 %v1785_v47, %v1300_v46 }
  0x36   :  { %538 = vmatpush.bf16.msrb.mxu1 %v1445_v35  ;;  %v1286_v53 = vld [vmem:[%s2836_s1 + $0x38] sm:$0xf0]  ;;  %490 = vmatmul.bf16.gmra.mxu2 %v2305_v34  ;;  %v1813_v55 = vld [vmem:[%s2836_s1 + $0x134] sm:$0xf0]  ;;  %v1433_v57 = vor.u32 %v1815_v48, %v1430_v51  ;;  %v1284_v59 = vld [vmem:[%s2836_s1 + $0x28] sm:$0xf] }
  0x37   :  { %509 = vmatmul.bf16.gmra.mxu3 %v2316_v39  ;;  %519 = vmatpush.bf16.msrb.mxu0 %v1317_v42  ;;  %v1289_v58 = vor.u32 %v1779_v52, %v1286_v53  ;;  %v1781_v60 = vld [vmem:[%s2836_s1 + $0x34] sm:$0xf0]  ;;  %v1811_v61 = vld [vmem:[%s2836_s1 + $0x12c] sm:$0xf]  ;;  %v1413_v62 = vor.u32 %v1813_v55, %v1412_v54  ;;  %v1414_v63 = vld [vmem:[%s2836_s1 + $0x138] sm:$0xf0] }
  0x38   :  { %576 = vmatpush.bf16.msrb.mxu3 %v1449_v43  ;;  %v1775_v0 = vld [vmem:[%s2836_s1 + $0xc] sm:$0xf]  ;;  %v1270_v1 = vld [vmem:[%s2836_s1 + $0x18] sm:$0xf0]  ;;  %v1396_v2 = vld [vmem:[%s2836_s1 + $0x108] sm:$0xf]  ;;  %v1285_v4 = vor.u32 %v1781_v60, %v1284_v59  ;;  %v1417_v7 = vor.u32 %v1811_v61, %v1414_v63 }
  0x39   :  { %558 = vmatpush.bf16.msrb.mxu2 %v1305_v45  ;;  %v1809_v3 = vld [vmem:[%s2836_s1 + $0x114] sm:$0xf0]  ;;  %v1636_v5 = vld [vmem:[%s2838_s3 + $0xf0] sm:$0xf]  ;;  %v1273_v8 = vor.u32 %v1775_v0, %v1270_v1  ;;  %v1268_v9 = vld [vmem:[%s2836_s1 + $0x8] sm:$0xf] }
  0x3a   :  { %539 = vmatpush.bf16.msrb.mxu1 %v1429_v50  ;;  %v1869_v6 = vld [vmem:[%s2838_s3 + $0xf4] sm:$0xf0]  ;;  %v1807_v11 = vld [vmem:[%s2836_s1 + $0x10c] sm:$0xf]  ;;  %v1397_v12 = vor.u32 %v1809_v3, %v1396_v2  ;;  %v1398_v13 = vld [vmem:[%s2836_s1 + $0x118] sm:$0xf0] }
  0x3b   :  { %520 = vmatpush.bf16.msrb.mxu0 %v1301_v56  ;;  %v1777_v10 = vld [vmem:[%s2836_s1 + $0x14] sm:$0xf0]  ;;  %v1572_v14 = vld [vmem:[%s2838_s3 + $0x70] sm:$0xf]  ;;  %v1637_v16 = vor.u32 %v1869_v6, %v1636_v5  ;;  %v1401_v18 = vor.u32 %v1807_v11, %v1398_v13  ;;  %v1564_v20 = vld [vmem:[%s2838_s3 + $0x60] sm:$0xf] }
  0x3c   :  { %577 = vmatpush.bf16.msrb.mxu3 %v1433_v57  ;;  %v1853_v15 = vld [vmem:[%s2838_s3 + $0x74] sm:$0xf0]  ;;  %v1269_v17 = vor.u32 %v1777_v10, %v1268_v9  ;;  %v1851_v21 = vld [vmem:[%s2838_s3 + $0x64] sm:$0xf0]  ;;  %v1628_v22 = vld [vmem:[%s2838_s3 + $0xe0] sm:$0xf] }
  0x3d   :  { %559 = vmatpush.bf16.msrb.mxu2 %v1289_v58  ;;  %v1573_v19 = vor.u32 %v1853_v15, %v1572_v14  ;;  %v1867_v23 = vld [vmem:[%s2838_s3 + $0xe4] sm:$0xf0]  ;;  %v1565_v24 = vor.u32 %v1851_v21, %v1564_v20  ;;  %v1556_v26 = vld [vmem:[%s2838_s3 + $0x50] sm:$0xf]  ;;  %v1849_v27 = vld [vmem:[%s2838_s3 + $0x54] sm:$0xf0] }
  0x3e   :  { %540 = vmatpush.bf16.msrb.mxu1 %v1413_v62  ;;  %v1629_v25 = vor.u32 %v1867_v23, %v1628_v22  ;;  %v1557_v28 = vor.u32 %v1849_v27, %v1556_v26  ;;  %v1548_v29 = vld [vmem:[%s2838_s3 + $0x40] sm:$0xf]  ;;  %v1847_v30 = vld [vmem:[%s2838_s3 + $0x44] sm:$0xf0]  ;;  %v1540_v33 = vld [vmem:[%s2838_s3 + $0x30] sm:$0xf] }
  0x3f   :  { %521 = vmatpush.bf16.msrb.mxu0 %v1285_v4  ;;  %v1549_v31 = vor.u32 %v1847_v30, %v1548_v29  ;;  %v1845_v35 = vld [vmem:[%s2838_s3 + $0x34] sm:$0xf0]  ;;  %v1612_v36 = vld [vmem:[%s2838_s3 + $0xc0] sm:$0xf]  ;;  %v1863_v37 = vld [vmem:[%s2838_s3 + $0xc4] sm:$0xf0] }
  0x40   :  { %578 = vmatpush.bf16.msrb.mxu3 %v1417_v7  ;;  %v1613_v38 = vor.u32 %v1863_v37, %v1612_v36  ;;  %v1843_v40 = vld [vmem:[%s2838_s3 + $0x24] sm:$0xf0]  ;;  %v1604_v42 = vld [vmem:[%s2838_s3 + $0xb0] sm:$0xf]  ;;  %v1861_v43 = vld [vmem:[%s2838_s3 + $0xb4] sm:$0xf0] }
  0x41   :  { %560 = vmatpush.bf16.msrb.mxu2 %v1273_v8  ;;  %v1605_v45 = vor.u32 %v1861_v43, %v1604_v42  ;;  %v1524_v46 = vld [vmem:[%s2838_s3 + $0x10] sm:$0xf]  ;;  %v1841_v47 = vld [vmem:[%s2838_s3 + $0x14] sm:$0xf0]  ;;  %v1596_v50 = vld [vmem:[%s2838_s3 + $0xa0] sm:$0xf] }
  0x42   :  { %541 = vmatpush.bf16.msrb.mxu1 %v1397_v12  ;;  %v1525_v48 = vor.u32 %v1841_v47, %v1524_v46  ;;  %v1859_v51 = vld [vmem:[%s2838_s3 + $0xa4] sm:$0xf0]  ;;  %v1516_v53 = vld [vmem:[%s2838_s3] sm:$0xf]  ;;  %v1588_v56 = vld [vmem:[%s2838_s3 + $0x90] sm:$0xf] }
  0x43   :  { %522 = vmatpush.bf16.msrb.mxu0 %v1269_v17  ;;  %v1597_v52 = vor.u32 %v1859_v51, %v1596_v50  ;;  %v1839_v54 = vld [vmem:[%s2838_s3 + $0x4] sm:$0xf0]  ;;  %v1857_v57 = vld [vmem:[%s2838_s3 + $0x94] sm:$0xf0]  ;;  %v1700_v59 = vld [vmem:[%s2838_s3 + $0x170] sm:$0xf] }
  0x44   :  { %579 = vmatpush.bf16.msrb.mxu3 %v1401_v18  ;;  %v1517_v55 = vor.u32 %v1839_v54, %v1516_v53  ;;  %v1589_v58 = vor.u32 %v1857_v57, %v1588_v56  ;;  %v1885_v60 = vld [vmem:[%s2838_s3 + $0x174] sm:$0xf0]  ;;  %v1852_v61 = vld [vmem:[%s2838_s3 + $0x74] sm:$0xf]  ;;  %v1574_v63 = vld [vmem:[%s2838_s3 + $0x78] sm:$0xf0] }
  0x45   :  { %542 = vmatmul.bf16.vlgmr.msrb.gmra.mxu1 %v2200_v49  ;;  %v1701_v62 = vor.u32 %v1885_v60, %v1700_v59  ;;  %v1577_v0 = vor.u32 %v1852_v61, %v1574_v63  ;;  %v1580_v1 = vld [vmem:[%s2838_s3 + $0x80] sm:$0xf]  ;;  %v1855_v2 = vld [vmem:[%s2838_s3 + $0x84] sm:$0xf0]  ;;  %v1850_v6 = vld [vmem:[%s2838_s3 + $0x64] sm:$0xf] }
  0x46   :  { %1018 = vmatpush.bf16.msra.mxu1 %v1637_v16  ;;  %523 = vmatmul.bf16.vlgmr.msrb.gmra.mxu0 %v2189_v44  ;;  %v1581_v3 = vor.u32 %v1855_v2, %v1580_v1  ;;  %v1692_v4 = vld [vmem:[%s2838_s3 + $0x160] sm:$0xf]  ;;  %v1883_v5 = vld [vmem:[%s2838_s3 + $0x164] sm:$0xf0]  ;;  %v1566_v8 = vld [vmem:[%s2838_s3 + $0x68] sm:$0xf0] }
  0x47   :  { %999 = vmatpush.bf16.msra.mxu0 %v1573_v19  ;;  %561 = vmatmul.bf16.vlgmr.msrb.gmra.mxu2 %v2189_v44  ;;  %v1620_v44 = vld [vmem:[%s2838_s3 + $0xd0] sm:$0xf]  ;;  %v1693_v7 = vor.u32 %v1883_v5, %v1692_v4  ;;  %v1569_v9 = vor.u32 %v1850_v6, %v1566_v8  ;;  %v1901_v11 = vld [vmem:[%s2838_s3 + $0x1f4] sm:$0xf0]  ;;  %v1868_v12 = vld [vmem:[%s2838_s3 + $0xf4] sm:$0xf] }
  0x48   :  { %580 = vmatmul.bf16.vlgmr.msrb.gmra.mxu3 %v2200_v49  ;;  %v1865_v49 = vld [vmem:[%s2838_s3 + $0xd4] sm:$0xf0]  ;;  %1037 = vmatpush.bf16.msra.mxu2 %v1701_v62  ;;  %v1764_v10 = vld [vmem:[%s2838_s3 + $0x1f0] sm:$0xf]  ;;  %v1638_v14 = vld [vmem:[%s2838_s3 + $0xf8] sm:$0xf0] }
  0x49   :  { %v1621_v32 = vor.u32 %v1865_v49, %v1620_v44  ;;  %v1765_v13 = vor.u32 %v1901_v11, %v1764_v10  ;;  %v1641_v15 = vor.u32 %v1868_v12, %v1638_v14  ;;  %v1684_v16 = vld [vmem:[%s2838_s3 + $0x150] sm:$0xf]  ;;  %v1881_v17 = vld [vmem:[%s2838_s3 + $0x154] sm:$0xf0]  ;;  %v1848_v18 = vld [vmem:[%s2838_s3 + $0x54] sm:$0xf] }
  0x4a   :  { %1019 = vmatpush.bf16.msra.mxu1 %v1629_v25  ;;  %v1685_v19 = vor.u32 %v1881_v17, %v1684_v16  ;;  %v1558_v20 = vld [vmem:[%s2838_s3 + $0x58] sm:$0xf0]  ;;  %v1756_v22 = vld [vmem:[%s2838_s3 + $0x1e0] sm:$0xf]  ;;  %v1899_v23 = vld [vmem:[%s2838_s3 + $0x1e4] sm:$0xf0] }
  0x4b   :  { %1000 = vmatpush.bf16.msra.mxu0 %v1565_v24  ;;  %1056 = vmatpush.bf16.msra.mxu3 %v1765_v13  ;;  %v1561_v21 = vor.u32 %v1848_v18, %v1558_v20  ;;  %v1866_v24 = vld [vmem:[%s2838_s3 + $0xe4] sm:$0xf]  ;;  %v2552_v25 = vld [vmem:[%s2837_s2] sm:$0xf]  ;;  %v1757_v26 = vor.u32 %v1899_v23, %v1756_v22  ;;  %v1630_v27 = vld [vmem:[%s2838_s3 + $0xe8] sm:$0xf0] }
  0x4c   :  { %1038 = vmatpush.bf16.msra.mxu2 %v1693_v7  ;;  %v1676_v29 = vld [vmem:[%s2838_s3 + $0x140] sm:$0xf]  ;;  %v1879_v30 = vld [vmem:[%s2838_s3 + $0x144] sm:$0xf0]  ;;  %v1550_v49 = vld [vmem:[%s2838_s3 + $0x48] sm:$0xf0] }
  0x4d   :  { %v1677_v44 = vor.u32 %v1879_v30, %v1676_v29  ;;  %v2579_v36 = vperm.slane %v2552_v25, 0  ;;  %v1668_v42 = vld [vmem:[%s2838_s3 + $0x130] sm:$0xf]  ;;  %v1877_v43 = vld [vmem:[%s2838_s3 + $0x134] sm:$0xf0]  ;;  %s1230_s24 = sshll.u32 %s2840_s5, 4  ;;  %s1231_s24 = int_to_ptr.hbm [resolvable:$true] %s1230_s24 }
  0x4e   :  { %1020 = vmatpush.bf16.msra.mxu1 %v1621_v32  ;;  %v1669_v46 = vor.u32 %v1877_v43, %v1668_v42  ;;  %v1542_v47 = vld [vmem:[%s2838_s3 + $0x38] sm:$0xf0]  ;;  %v1740_v50 = vld [vmem:[%s2838_s3 + $0x1c0] sm:$0xf]  ;;  %v1895_v51 = vld [vmem:[%s2838_s3 + $0x1c4] sm:$0xf0] }
  0x4f   :  { %1001 = vmatpush.bf16.msra.mxu0 %v1557_v28  ;;  %v1633_v28 = vor.u32 %v1866_v24, %v1630_v27  ;;  %1057 = vmatpush.bf16.msra.mxu3 %v1757_v26  ;;  %v1741_v53 = vor.u32 %v1895_v51, %v1740_v50  ;;  %v1614_v54 = vld [vmem:[%s2838_s3 + $0xc8] sm:$0xf0]  ;;  %v1660_v57 = vld [vmem:[%s2838_s3 + $0x120] sm:$0xf]  ;;  %v1842_v60 = vld [vmem:[%s2838_s3 + $0x24] sm:$0xf] }
  0x50   :  { %1039 = vmatpush.bf16.msra.mxu2 %v1685_v19  ;;  %v1534_v61 = vld [vmem:[%s2838_s3 + $0x28] sm:$0xf0]  ;;  %v1893_v1 = vld [vmem:[%s2838_s3 + $0x1b4] sm:$0xf0]  ;;  %v1860_v2 = vld [vmem:[%s2838_s3 + $0xb4] sm:$0xf] }
  0x51   :  { %v1537_v63 = vor.u32 %v1842_v60, %v1534_v61  ;;  %v1606_v7 = vld [vmem:[%s2838_s3 + $0xb8] sm:$0xf0]  ;;  %v1652_v12 = vld [vmem:[%s2838_s3 + $0x110] sm:$0xf]  ;;  %v1873_v13 = vld [vmem:[%s2838_s3 + $0x114] sm:$0xf0] }
  0x52   :  { %1021 = vmatpush.bf16.msra.mxu1 %v1613_v38  ;;  %v1609_v11 = vor.u32 %v1860_v2, %v1606_v7  ;;  %v1840_v14 = vld [vmem:[%s2838_s3 + $0x14] sm:$0xf]  ;;  %v1526_v16 = vld [vmem:[%s2838_s3 + $0x18] sm:$0xf0]  ;;  %v1724_v19 = vld [vmem:[%s2838_s3 + $0x1a0] sm:$0xf] }
  0x53   :  { %1002 = vmatpush.bf16.msra.mxu0 %v1549_v31  ;;  %v1846_v31 = vld [vmem:[%s2838_s3 + $0x44] sm:$0xf]  ;;  %v1529_v18 = vor.u32 %v1840_v14, %v1526_v16  ;;  %v1891_v20 = vld [vmem:[%s2838_s3 + $0x1a4] sm:$0xf0]  ;;  %v1598_v24 = vld [vmem:[%s2838_s3 + $0xa8] sm:$0xf0] }
  0x54   :  { %v1553_v32 = vor.u32 %v1846_v31, %v1550_v49  ;;  %1040 = vmatpush.bf16.msra.mxu2 %v1677_v44  ;;  %v1725_v23 = vor.u32 %v1891_v20, %v1724_v19  ;;  %v1644_v29 = vld [vmem:[%s2838_s3 + $0x100] sm:$0xf]  ;;  %v1871_v30 = vld [vmem:[%s2838_s3 + $0x104] sm:$0xf0]  ;;  %v1838_v44 = vld [vmem:[%s2838_s3 + $0x4] sm:$0xf] }
  0x55   :  { %547 = vmatmul.bf16.gmra.mxu1 %v2316_v39  ;;  %v1645_v31 = vor.u32 %v1871_v30, %v1644_v29  ;;  %v1518_v49 = vld [vmem:[%s2838_s3 + $0x8] sm:$0xf0]  ;;  %v1702_v50 = vld [vmem:[%s2838_s3 + $0x178] sm:$0xf0]  ;;  %v1898_v16 = vld [vmem:[%s2838_s3 + $0x1e4] sm:$0xf] }
  0x56   :  { %528 = vmatmul.bf16.gmra.mxu0 %v2305_v34  ;;  %1022 = vmatpush.bf16.msra.mxu1 %v1605_v45  ;;  %v1844_v45 = vld [vmem:[%s2838_s3 + $0x34] sm:$0xf]  ;;  %s1932_s25 = smov 128   ;;  %s1933_s26 = smov 8  }
  0x57   :  { %566 = vmatmul.bf16.gmra.mxu2 %v2305_v34  ;;  %v1541_v34 = vor.u32 %v1845_v35, %v1540_v33  ;;  %v1748_v33 = vld [vmem:[%s2838_s3 + $0x1d0] sm:$0xf]  ;;  %v1897_v35 = vld [vmem:[%s2838_s3 + $0x1d4] sm:$0xf0] }
  0x58   :  { %585 = vmatmul.bf16.gmra.mxu3 %v2316_v39  ;;  %v1532_v39 = vld [vmem:[%s2838_s3 + $0x20] sm:$0xf]  ;;  %v1749_v38 = vor.u32 %v1897_v35, %v1748_v33  ;;  %1041 = vmatpush.bf16.msra.mxu2 %v1669_v46  ;;  %v1521_v35 = vor.u32 %v1838_v44, %v1518_v49 }
  0x59   :  { %1003 = vmatpush.bf16.msra.mxu0 %v1541_v34  ;;  %v1533_v41 = vor.u32 %v1843_v40, %v1532_v39  ;;  %v1864_v34 = vld [vmem:[%s2838_s3 + $0xd4] sm:$0xf]  ;;  %v1622_v39 = vld [vmem:[%s2838_s3 + $0xd8] sm:$0xf0] }
  0x5a   :  { %1023 = vmatpush.bf16.msra.mxu1 %v1597_v52  ;;  %1058 = vmatpush.bf16.msra.mxu3 %v1749_v38  ;;  %v1862_v52 = vld [vmem:[%s2838_s3 + $0xc4] sm:$0xf]  ;;  %v1856_v38 = vld [vmem:[%s2838_s3 + $0x94] sm:$0xf] }
  0x5b   :  { %v1617_v56 = vor.u32 %v1862_v52, %v1614_v54  ;;  %v1887_v54 = vld [vmem:[%s2838_s3 + $0x184] sm:$0xf0] }
  0x5d   :  { %1004 = vmatpush.bf16.msra.mxu0 %v1533_v41  ;;  %v1625_v41 = vor.u32 %v1864_v34, %v1622_v39  ;;  %v1716_v34 = vld [vmem:[%s2838_s3 + $0x190] sm:$0xf] }
  0x5e   :  { %1024 = vmatpush.bf16.msra.mxu1 %v1589_v58  ;;  %v1875_v58 = vld [vmem:[%s2838_s3 + $0x124] sm:$0xf0]  ;;  %1059 = vmatpush.bf16.msra.mxu3 %v1741_v53  ;;  %v1708_v53 = vld [vmem:[%s2838_s3 + $0x180] sm:$0xf] }
  0x5f   :  { %v1661_v59 = vor.u32 %v1875_v58, %v1660_v57  ;;  %v1709_v58 = vor.u32 %v1887_v54, %v1708_v53  ;;  %v2785_v53 = vperm.slane %v2552_v25, 3 }
  0x61   :  { %1005 = vmatpush.bf16.msra.mxu0 %v1525_v48  ;;  %v1545_v48 = vor.u32 %v1844_v45, %v1542_v47  ;;  %1042 = vmatpush.bf16.msra.mxu2 %v1661_v59  ;;  %v1590_v45 = vld [vmem:[%s2838_s3 + $0x98] sm:$0xf0]  ;;  %v1582_v59 = vld [vmem:[%s2838_s3 + $0x88] sm:$0xf0] }
  0x62   :  { %1025 = vmatpush.bf16.msra.mxu1 %v1581_v3  ;;  %v2631_v3 = vperm.slane %v2552_v25, 1  ;;  %v1593_v47 = vor.u32 %v1856_v38, %v1590_v45  ;;  %v2761_v38 = vperm.slane %v2552_v25, 2  ;;  %v1874_v45 = vld [vmem:[%s2838_s3 + $0x124] sm:$0xf] }
  0x63   :  { %v1890_v25 = vld [vmem:[%s2838_s3 + $0x1a4] sm:$0xf] }
  0x65   :  { %1006 = vmatpush.bf16.msra.mxu0 %v1517_v55 }
  0x66   :  { %1094 = vmatpush.bf16.msrb.mxu1 %v1641_v15  ;;  %v1653_v15 = vor.u32 %v1873_v13, %v1652_v12  ;;  %v1880_v12 = vld [vmem:[%s2838_s3 + $0x154] sm:$0xf]  ;;  %v1686_v13 = vld [vmem:[%s2838_s3 + $0x158] sm:$0xf0] }
  0x67   :  { %v1689_v14 = vor.u32 %v1880_v12, %v1686_v13 }
  0x68   :  { %1043 = vmatpush.bf16.msra.mxu2 %v1653_v15 }
  0x69   :  { %1075 = vmatpush.bf16.msrb.mxu0 %v1577_v0  ;;  %v1732_v0 = vld [vmem:[%s2838_s3 + $0x1b0] sm:$0xf] }
  0x6a   :  { %1095 = vmatpush.bf16.msrb.mxu1 %v1633_v28  ;;  %v1733_v6 = vor.u32 %v1893_v1, %v1732_v0 }
  0x6c   :  { %1060 = vmatpush.bf16.msra.mxu3 %v1733_v6  ;;  %1044 = vmatpush.bf16.msra.mxu2 %v1645_v31 }
  0x6d   :  { %1076 = vmatpush.bf16.msrb.mxu0 %v1569_v9 }
  0x6e   :  { %1096 = vmatpush.bf16.msrb.mxu1 %v1625_v41 }
  0x70   :  { %1061 = vmatpush.bf16.msra.mxu3 %v1725_v23 }
  0x71   :  { %1077 = vmatpush.bf16.msrb.mxu0 %v1561_v21  ;;  %v1858_v21 = vld [vmem:[%s2838_s3 + $0xa4] sm:$0xf] }
  0x72   :  { %1097 = vmatpush.bf16.msrb.mxu1 %v1617_v56  ;;  %v1601_v28 = vor.u32 %v1858_v21, %v1598_v24  ;;  %v1878_v21 = vld [vmem:[%s2838_s3 + $0x144] sm:$0xf] }
  0x75   :  { %1078 = vmatpush.bf16.msrb.mxu0 %v1553_v32 }
  0x76   :  { %1098 = vmatpush.bf16.msrb.mxu1 %v1609_v11 }
  0x79   :  { %1079 = vmatpush.bf16.msrb.mxu0 %v1545_v48  ;;  %v1884_v48 = vld [vmem:[%s2838_s3 + $0x174] sm:$0xf] }
  0x7a   :  { %1099 = vmatpush.bf16.msrb.mxu1 %v1601_v28  ;;  %v1705_v52 = vor.u32 %v1884_v48, %v1702_v50  ;;  %v1750_v28 = vld [vmem:[%s2838_s3 + $0x1d8] sm:$0xf0] }
  0x7c   :  { %1113 = vmatpush.bf16.msrb.mxu2 %v1705_v52  ;;  %v1734_v52 = vld [vmem:[%s2838_s3 + $0x1b8] sm:$0xf0] }
  0x7d   :  { %1080 = vmatpush.bf16.msrb.mxu0 %v1537_v63  ;;  %v1694_v63 = vld [vmem:[%s2838_s3 + $0x168] sm:$0xf0] }
  0x7e   :  { %1100 = vmatpush.bf16.msrb.mxu1 %v1593_v47 }
  0x81   :  { %1081 = vmatpush.bf16.msrb.mxu0 %v1529_v18 }
  0x85   :  { %1082 = vmatpush.bf16.msrb.mxu0 %v1521_v35  ;;  %v1876_v35 = vld [vmem:[%s2838_s3 + $0x134] sm:$0xf] }
  0xa0   :  { %v448_v37 = vpop.f32.mrf.mxu0 }
  0xa1   :  { %v467_v40 = vpop.f32.mrf.mxu1  ;;  %v449_v55 = vadd.f32 %v448_v37, %v2579_v36  ;;  %v1889_v37 = vld [vmem:[%s2838_s3 + $0x194] sm:$0xf0] }
  0xa2   :  { %v1717_v43 = vor.u32 %v1889_v37, %v1716_v34  ;;  %v1670_v34 = vld [vmem:[%s2838_s3 + $0x138] sm:$0xf0] }
  0xa3   :  { %v468_v8 = vadd.f32 %v467_v40, %v449_v55  ;;  %v1854_v55 = vld [vmem:[%s2838_s3 + $0x84] sm:$0xf] }
  0xa4   :  { %1062 = vmatpush.bf16.msra.mxu3 %v1717_v43  ;;  %v1585_v61 = vor.u32 %v1854_v55, %v1582_v59  ;;  %v1872_v59 = vld [vmem:[%s2838_s3 + $0x114] sm:$0xf] }
  0xa5   :  { %v591_v26 = vmax.f32 %v468_v8, 0.0 }
  0xa6   :  { %1101 = vmatpush.bf16.msrb.mxu1 %v1585_v61 }
  0xa7   :  { %v486_v62 = vpop.f32.mrf.mxu2 }
  0xa8   :  { %v450_v5 = vpop.f32.mrf.mxu0  ;;  %v487_v22 = vadd.f32 %v486_v62, %v2631_v3  ;;  %v1882_v62 = vld [vmem:[%s2838_s3 + $0x164] sm:$0xf]  ;;  %1063 = vmatpush.bf16.msra.mxu3 %v1709_v58 }
  0xa9   :  { %v505_v4 = vpop.f32.mrf.mxu3  ;;  %v451_v9 = vadd.f32 %v450_v5, %v2579_v36  ;;  %v469_v10 = vpop.f32.mrf.mxu1  ;;  %v1697_v1 = vor.u32 %v1882_v62, %v1694_v63  ;;  %v1766_v5 = vld [vmem:[%s2838_s3 + $0x1f8] sm:$0xf0] }
  0xaa   :  { %v506_v39 = vadd.f32 %v505_v4, %v487_v22  ;;  %v1900_v4 = vld [vmem:[%s2838_s3 + $0x1f4] sm:$0xf]  ;;  %v1678_v22 = vld [vmem:[%s2838_s3 + $0x148] sm:$0xf0] }
  0xab   :  { %v470_v17 = vadd.f32 %v469_v10, %v451_v9  ;;  %1114 = vmatpush.bf16.msrb.mxu2 %v1697_v1  ;;  %v1769_v8 = vor.u32 %v1900_v4, %v1766_v5  ;;  %v1681_v23 = vor.u32 %v1878_v21, %v1678_v22  ;;  %v1726_v1 = vld [vmem:[%s2838_s3 + $0x1a8] sm:$0xf0] }
  0xac   :  { %v592_v56 = vmax.f32 %v506_v39, 0.0  ;;  %v1894_v39 = vld [vmem:[%s2838_s3 + $0x1c4] sm:$0xf]  ;;  %v1646_v4 = vld [vmem:[%s2838_s3 + $0x108] sm:$0xf0]  ;;  %v1729_v5 = vor.u32 %v1890_v25, %v1726_v1 }
  0xad   :  { %v595_v27 = vmax.f32 %v470_v17, 0.0  ;;  %1132 = vmatpush.bf16.msrb.mxu3 %v1769_v8  ;;  %v1710_v21 = vld [vmem:[%s2838_s3 + $0x188] sm:$0xf0] }
  0xaf   :  { %v2674_v32 = vpack.c.bf16 %v595_v27, %v591_v26  ;;  %v488_v33 = vpop.f32.mrf.mxu2  ;;  %1115 = vmatpush.bf16.msrb.mxu2 %v1689_v14  ;;  %v1896_v27 = vld [vmem:[%s2838_s3 + $0x1d4] sm:$0xf] }
  0xb0   :  { %v489_v40 = vadd.f32 %v488_v33, %v2631_v3  ;;  %v1753_v44 = vor.u32 %v1896_v27, %v1750_v28 }
  0xb1   :  { %v507_v41 = vpop.f32.mrf.mxu3  ;;  %v453_v42 = vpop.f32.mrf.mxu0  ;;  %1007 = vmatmul.bf16.vlgmr.msra.gmra.mxu0 %v2674_v32 }
  0xb2   :  { %v472_v46 = vpop.f32.mrf.mxu1  ;;  %v508_v51 = vadd.f32 %v507_v41, %v489_v40  ;;  %v454_v60 = vadd.f32 %v453_v42, %v2579_v36  ;;  %v1742_v40 = vld [vmem:[%s2838_s3 + $0x1c8] sm:$0xf0] }
  0xb3   :  { %1116 = vmatpush.bf16.msrb.mxu2 %v1681_v23  ;;  %v1745_v43 = vor.u32 %v1894_v39, %v1742_v40 }
  0xb4   :  { %v596_v57 = vmax.f32 %v508_v51, 0.0  ;;  %v473_v9 = vadd.f32 %v472_v46, %v454_v60  ;;  %v1662_v46 = vld [vmem:[%s2838_s3 + $0x128] sm:$0xf0]  ;;  %v1892_v51 = vld [vmem:[%s2838_s3 + $0x1b4] sm:$0xf] }
  0xb5   :  { %v1665_v50 = vor.u32 %v1874_v45, %v1662_v46  ;;  %v1654_v60 = vld [vmem:[%s2838_s3 + $0x118] sm:$0xf0] }
  0xb6   :  { %v2715_v0 = vpack.c.bf16 %v596_v57, %v592_v56  ;;  %v599_v19 = vmax.f32 %v473_v9, 0.0  ;;  %v1737_v56 = vor.u32 %v1892_v51, %v1734_v52  ;;  %v1657_v63 = vor.u32 %v1872_v59, %v1654_v60 }
  0xb8   :  { %1026 = vmatmul.bf16.vlgmr.msra.gmra.mxu1 %v2715_v0 }
  0xb9   :  { %v491_v2 = vpop.f32.mrf.mxu2  ;;  %v455_v7 = vpop.f32.mrf.mxu0 }
  0xba   :  { %v510_v6 = vpop.f32.mrf.mxu3  ;;  %v456_v10 = vadd.f32 %v455_v7, %v2579_v36  ;;  %v474_v11 = vpop.f32.mrf.mxu1  ;;  %v1758_v36 = vld [vmem:[%s2838_s3 + $0x1e8] sm:$0xf0]  ;;  %v492_v17 = vadd.f32 %v491_v2, %v2631_v3  ;;  %v1870_v2 = vld [vmem:[%s2838_s3 + $0x104] sm:$0xf]  ;;  %v1718_v7 = vld [vmem:[%s2838_s3 + $0x198] sm:$0xf0] }
  0xbb   :  { %v1761_v18 = vor.u32 %v1898_v16, %v1758_v36  ;;  %v1649_v9 = vor.u32 %v1870_v2, %v1646_v4  ;;  %v1202_v4 = vld [vmem:[%s2839_s4] sm:$0x3]  ;;  %s1931_s4 = smov [#allocation3]  }
  0xbc   :  { %v475_v15 = vadd.f32 %v474_v11, %v456_v10  ;;  %v511_v29 = vadd.f32 %v510_v6, %v492_v17  ;;  %v1888_v6 = vld [vmem:[%s2838_s3 + $0x194] sm:$0xf]  ;;  %s1228_s1 = sshll.u32 %s1931_s4, 4  ;;  %s1229_s1 = int_to_ptr.vmem [resolvable:$true] %s1228_s1 }
  0xbd   :  { %1133 = vmatpush.bf16.msrb.mxu3 %v1761_v18  ;;  %v1721_v13 = vor.u32 %v1888_v6, %v1718_v7 }
  0xbe   :  { %v603_v20 = vmax.f32 %v475_v15, 0.0  ;;  %v600_v41 = vmax.f32 %v511_v29, 0.0 }
  0xc0   :  { %v2744_v26 = vpack.c.bf16 %v603_v20, %v599_v19  ;;  %v1886_v20 = vld [vmem:[%s2838_s3 + $0x184] sm:$0xf] }
  0xc1   :  { %v493_v24 = vpop.f32.mrf.mxu2  ;;  %1134 = vmatpush.bf16.msrb.mxu3 %v1753_v44  ;;  %v1713_v23 = vor.u32 %v1886_v20, %v1710_v21 }
  0xc2   :  { %v494_v30 = vadd.f32 %v493_v24, %v2631_v3  ;;  %v512_v31 = vpop.f32.mrf.mxu3  ;;  %v543_v33 = vpop.f32.mrf.mxu1  ;;  %1012 = vmatmul.bf16.gmra.mxu0 %v2744_v26  ;;  %v1673_v3 = vor.u32 %v1876_v35, %v1670_v34 }
  0xc3   :  { %v524_v49 = vpop.f32.mrf.mxu0 }
  0xc4   :  { %v513_v37 = vadd.f32 %v512_v31, %v494_v30  ;;  %1117 = vmatpush.bf16.msrb.mxu2 %v1673_v3  ;;  %v525_v47 = vadd.f32 %v524_v49, %v2761_v38 }
  0xc5   :  { %1135 = vmatpush.bf16.msrb.mxu3 %v1745_v43 }
  0xc6   :  { %v604_v42 = vmax.f32 %v513_v37, 0.0  ;;  %v544_v61 = vadd.f32 %v543_v33, %v525_v47 }
  0xc8   :  { %v2776_v48 = vpack.c.bf16 %v604_v42, %v600_v41  ;;  %1118 = vmatpush.bf16.msrb.mxu2 %v1665_v50  ;;  %v593_v11 = vmax.f32 %v544_v61, 0.0 }
  0xc9   :  { %1136 = vmatpush.bf16.msrb.mxu3 %v1737_v56 }
  0xca   :  { %v562_v54 = vpop.f32.mrf.mxu2  ;;  %1031 = vmatmul.bf16.gmra.mxu1 %v2776_v48  ;;  %v545_v58 = vpop.f32.mrf.mxu1 }
  0xcb   :  { %v581_v55 = vpop.f32.mrf.mxu3  ;;  %v526_v57 = vpop.f32.mrf.mxu0  ;;  %v563_v10 = vadd.f32 %v562_v54, %v2785_v53 }
  0xcc   :  { %v527_v62 = vadd.f32 %v526_v57, %v2761_v38  ;;  %1119 = vmatpush.bf16.msrb.mxu2 %v1657_v63 }
  0xcd   :  { %1137 = vmatpush.bf16.msrb.mxu3 %v1729_v5  ;;  %v582_v36 = vadd.f32 %v581_v55, %v563_v10 }
  0xce   :  { %v546_v8 = vadd.f32 %v545_v58, %v527_v62 }
  0xcf   :  { %v594_v24 = vmax.f32 %v582_v36, 0.0 }
  0xd0   :  { %v597_v12 = vmax.f32 %v546_v8, 0.0  ;;  %1120 = vmatpush.bf16.msrb.mxu2 %v1649_v9  ;;  %v1204_v9 = vperm.slane %v1202_v4, 0 }
  0xd1   :  { %1138 = vmatpush.bf16.msrb.mxu3 %v1721_v13 }
  0xd2   :  { %v609_v14 = vpack.c.bf16 %v597_v12, %v593_v11  ;;  %v564_v15 = vpop.f32.mrf.mxu2  ;;  %v548_v19 = vpop.f32.mrf.mxu1  ;;  %1083 = vmatmul.bf16.vlgmr.msrb.gmra.mxu0 %v2674_v32  ;;  %v1205_v11 = vperm.slane %v1202_v4, 1 }
  0xd3   :  { %v583_v16 = vpop.f32.mrf.mxu3  ;;  %v565_v17 = vadd.f32 %v564_v15, %v2785_v53  ;;  %v529_v18 = vpop.f32.mrf.mxu0 }
  0xd4   :  { %1045 = vmatmul.bf16.vlgmr.msra.gmra.mxu2 %v609_v14  ;;  %v530_v28 = vadd.f32 %v529_v18, %v2761_v38 }
  0xd5   :  { %v584_v22 = vadd.f32 %v583_v16, %v565_v17  ;;  %1139 = vmatpush.bf16.msrb.mxu3 %v1713_v23 }
  0xd6   :  { %v549_v44 = vadd.f32 %v548_v19, %v530_v28 }
  0xd7   :  { %v598_v27 = vmax.f32 %v584_v22, 0.0 }
  0xd8   :  { %v601_v37 = vmax.f32 %v549_v44, 0.0 }
  0xd9   :  { %v610_v29 = vpack.c.bf16 %v598_v27, %v594_v24 }
  0xda   :  { %v567_v30 = vpop.f32.mrf.mxu2  ;;  %1102 = vmatmul.bf16.vlgmr.msrb.gmra.mxu1 %v2715_v0  ;;  %v550_v33 = vpop.f32.mrf.mxu1 }
  0xdb   :  { %v586_v32 = vpop.f32.mrf.mxu3  ;;  %1064 = vmatmul.bf16.vlgmr.msra.gmra.mxu3 %v610_v29  ;;  %v531_v31 = vpop.f32.mrf.mxu0  ;;  %v568_v34 = vadd.f32 %v567_v30, %v2785_v53 }
  0xdc   :  { %v532_v49 = vadd.f32 %v531_v31, %v2761_v38 }
  0xdd   :  { %v587_v41 = vadd.f32 %v586_v32, %v568_v34 }
  0xde   :  { %v551_v35 = vadd.f32 %v550_v33, %v532_v49 }
  0xdf   :  { %v602_v45 = vmax.f32 %v587_v41, 0.0 }
  0xe0   :  { %v605_v3 = vmax.f32 %v551_v35, 0.0 }
  0xe2   :  { %v569_v39 = vpop.f32.mrf.mxu2  ;;  %v613_v40 = vpack.c.bf16 %v605_v3, %v601_v37  ;;  %1088 = vmatmul.bf16.gmra.mxu0 %v2744_v26 }
  0xe3   :  { %v570_v42 = vadd.f32 %v569_v39, %v2785_v53  ;;  %v588_v43 = vpop.f32.mrf.mxu3 }
  0xe4   :  { %1050 = vmatmul.bf16.gmra.mxu2 %v613_v40 }
  0xe5   :  { %v589_v0 = vadd.f32 %v588_v43, %v570_v42 }
  0xe7   :  { %v606_v46 = vmax.f32 %v589_v0, 0.0 }
  0xe9   :  { %v614_v47 = vpack.c.bf16 %v606_v46, %v602_v45 }
  0xea   :  { %1107 = vmatmul.bf16.gmra.mxu1 %v2776_v48 }
  0xeb   :  { %1069 = vmatmul.bf16.gmra.mxu3 %v614_v47 }
  0xf4   :  { %1121 = vmatmul.bf16.vlgmr.msrb.gmra.mxu2 %v609_v14 }
  0xfb   :  { %1140 = vmatmul.bf16.vlgmr.msrb.gmra.mxu3 %v610_v29 }
 0x104   :  { %1126 = vmatmul.bf16.gmra.mxu2 %v613_v40 }
 0x10b   :  { %1145 = vmatmul.bf16.gmra.mxu3 %v614_v47 }
 0x12e   :  { %v1008_v50 = vpop.f32.mrf.mxu0 }
 0x135   :  { %v1027_v38 = vpop.f32.mrf.mxu1 }
 0x136   :  { %v1010_v52 = vpop.f32.mrf.mxu0  ;;  %v1028_v2 = vadd.f32 %v1027_v38, %v1008_v50 }
 0x13d   :  { %v1029_v51 = vpop.f32.mrf.mxu1 }
 0x13e   :  { %v1030_v16 = vadd.f32 %v1029_v51, %v1010_v52 }
 0x13f   :  { %v1013_v56 = vpop.f32.mrf.mxu0 }
 0x147   :  { %v1032_v54 = vpop.f32.mrf.mxu1  ;;  %v1015_v60 = vpop.f32.mrf.mxu0 }
 0x148   :  { %v1033_v30 = vadd.f32 %v1032_v54, %v1013_v56 }
 0x14f   :  { %v1034_v59 = vpop.f32.mrf.mxu1  ;;  %v1084_v62 = vpop.f32.mrf.mxu0 }
 0x150   :  { %v1035_v40 = vadd.f32 %v1034_v59, %v1015_v60 }
 0x157   :  { %v1046_v53 = vpop.f32.mrf.mxu2  ;;  %v1103_v61 = vpop.f32.mrf.mxu1 }
 0x158   :  { %v1047_v5 = vadd.f32 %v1046_v53, %v1028_v2  ;;  %v1104_v6 = vadd.f32 %v1103_v61, %v1084_v62  ;;  %v1086_v12 = vpop.f32.mrf.mxu0 }
 0x15e   :  { %v1065_v26 = vpop.f32.mrf.mxu3 }
 0x15f   :  { %v1048_v55 = vpop.f32.mrf.mxu2  ;;  %v1105_v7 = vpop.f32.mrf.mxu1  ;;  %v1066_v8 = vadd.f32 %v1065_v26, %v1047_v5 }
 0x160   :  { %v1049_v18 = vadd.f32 %v1048_v55, %v1030_v16  ;;  %v1106_v19 = vadd.f32 %v1105_v7, %v1086_v12  ;;  %v1089_v28 = vpop.f32.mrf.mxu0 }
 0x161   :  { %v1208_v36 = vadd.f32 %v1204_v9, %v1066_v8 }
 0x166   :  { %v1067_v57 = vpop.f32.mrf.mxu3 }
 0x167   :  { %v1051_v58 = vpop.f32.mrf.mxu2  ;;  %v1068_v21 = vadd.f32 %v1067_v57, %v1049_v18  ;;  %v1108_v23 = vpop.f32.mrf.mxu1 }
 0x168   :  { %v1052_v44 = vadd.f32 %v1051_v58, %v1033_v30  ;;  %v1109_v49 = vadd.f32 %v1108_v23, %v1089_v28  ;;  %v1091_v43 = vpop.f32.mrf.mxu0 }
 0x169   :  { %v1210_v32 = vadd.f32 %v1204_v9, %v1068_v21 }
 0x16e   :  { %v1070_v25 = vpop.f32.mrf.mxu3 }
 0x16f   :  { %v1053_v48 = vpop.f32.mrf.mxu2  ;;  %v1071_v35 = vadd.f32 %v1070_v25, %v1052_v44  ;;  %v1110_v39 = vpop.f32.mrf.mxu1 }
 0x170   :  { %v1054_v45 = vadd.f32 %v1053_v48, %v1035_v40  ;;  %v1111_v46 = vadd.f32 %v1110_v39, %v1091_v43 }
 0x171   :  { %v1212_v41 = vadd.f32 %v1204_v9, %v1071_v35 }
 0x176   :  { %v1072_v63 = vpop.f32.mrf.mxu3 }
 0x177   :  { %v1122_v1 = vpop.f32.mrf.mxu2  ;;  %v1073_v38 = vadd.f32 %v1072_v63, %v1054_v45 }
 0x178   :  { %v1123_v10 = vadd.f32 %v1122_v1, %v1104_v6 }
 0x179   :  { %v1214_v53 = vadd.f32 %v1204_v9, %v1073_v38 }
 0x17e   :  { %v1141_v13 = vpop.f32.mrf.mxu3 }
 0x17f   :  { %v1142_v14 = vadd.f32 %v1141_v13, %v1123_v10  ;;  %v1124_v15 = vpop.f32.mrf.mxu2 }
 0x180   :  { %v1125_v22 = vadd.f32 %v1124_v15, %v1106_v19 }
 0x181   :  { %v1209_v17 = vadd.f32 %v1205_v11, %v1142_v14 }
 0x183   :  { %v1216_v20 = vpack.c.bf16 %v1209_v17, %v1208_v36 }
 0x185   :  { %1220 = vst [vmem:[#allocation3] sm:$0xff] %v1216_v20 }
 0x186   :  { %v1143_v24 = vpop.f32.mrf.mxu3 }
 0x187   :  { %v1144_v27 = vadd.f32 %v1143_v24, %v1125_v22  ;;  %v1127_v29 = vpop.f32.mrf.mxu2 }
 0x188   :  { %v1128_v34 = vadd.f32 %v1127_v29, %v1109_v49 }
 0x189   :  { %v1211_v31 = vadd.f32 %v1205_v11, %v1144_v27 }
 0x18b   :  { %v1217_v33 = vpack.c.bf16 %v1211_v31, %v1210_v32 }
 0x18d   :  { %1221 = vst [vmem:[#allocation3 + $0x8] sm:$0xff] %v1217_v33 }
 0x18e   :  { %v1146_v37 = vpop.f32.mrf.mxu3 }
 0x18f   :  { %v1147_v3 = vadd.f32 %v1146_v37, %v1128_v34  ;;  %v1129_v0 = vpop.f32.mrf.mxu2 }
 0x190   :  { %v1130_v50 = vadd.f32 %v1129_v0, %v1111_v46 }
 0x191   :  { %v1213_v42 = vadd.f32 %v1205_v11, %v1147_v3 }
 0x193   :  { %v1218_v47 = vpack.c.bf16 %v1213_v42, %v1212_v41 }
 0x195   :  { %1222 = vst [vmem:[#allocation3 + $0x10] sm:$0xff] %v1218_v47 }
 0x196   :  { %v1148_v51 = vpop.f32.mrf.mxu3 }
 0x197   :  { %v1149_v52 = vadd.f32 %v1148_v51, %v1130_v50 }
 0x199   :  { %v1215_v54 = vadd.f32 %v1205_v11, %v1149_v52 }
 0x19b   :  { %v1219_v26 = vpack.c.bf16 %v1215_v54, %v1214_v53 }
 0x19d   :  { %1223 = vst [vmem:[#allocation3 + $0x18] sm:$0xff] %v1219_v26 }
 0x19e   :  { %1236 = dma.vmem_to_hbm [thread:$0]  %s1229_s1, 512, %s1231_s24, [#allocation4], %s1932_s25, %s1932_s25, %s1933_s26  }
 0x19f   :  { %1929 = dma.done.wait [#allocation4], 512  }
 0x1a0   :  { %1930 = vsyncadd [#allocation4], 4294966784 }
 0x1a1   :  { %1241 = vsyncpa [#allocation4], 1 }

</bundles_post_ra>
